<compile_context>
chip_gen: v5e
topology: v5e:2x2
jax: 0.10.0
libtpu: 0.0.40
codegen_flags: <defaults>
</compile_context>

<pallas_src>
import numpy as np
import jax
import jax.numpy as jnp
from jax import lax
from jax.experimental import pallas as pl
from jax.experimental.pallas import tpu as pltpu


# ------------------------- fused cross-attention kernel --------------------------

def _make_kernel(C, CK, CV, HW, QBLK):
    n_chunks = HW // QBLK

    def kernel(x1_ref, x2_ref, w_ref, b_ref, o_ref):
        # x1_ref/x2_ref: (1, C, HW) f32, channel-first, lane-dense.
        # w_ref: (CK + CK + CV + CV, C) f32 = [wq/sqrt(CK); wk; wv; wo^T]
        # b_ref: (CK + CK + CV + C , 1) f32 = [bq/sqrt(CK); bk; bv; bo]
        x1 = x1_ref[0]                                            # (C, HW)
        x2 = x2_ref[0]                                            # (C, HW)

        wq   = w_ref[0:CK, :]                                     # (CK, C)
        wkv  = w_ref[CK:CK + CK + CV, :]                          # (CK+CV, C)
        wo_t = w_ref[CK + CK + CV:CK + CK + CV + CV, :]           # (CV, C)
        bq   = b_ref[0:CK, :]                                     # (CK, 1)
        bkv  = b_ref[CK:CK + CK + CV, :]                          # (CK+CV, 1)
        bo   = b_ref[CK + CK + CV:CK + CK + CV + C, :]            # (C, 1)

        # 1x1 convs == channel matmuls (f32 accumulation). 1/sqrt(CK) is already
        # folded into wq/bq, so no (HW,HW) scaling later.  K and V share one matmul.
        q = jnp.dot(wq, x1, preferred_element_type=jnp.float32) + bq      # (CK, HW)
        kv = jnp.dot(wkv, x2, preferred_element_type=jnp.float32) + bkv   # (CK+CV, HW)
        k = kv[0:CK, :]
        v = kv[CK:CK + CV, :]

        # bf16 operands for the two big MXU matmuls (accumulation stays f32).
        q_bf = q.astype(jnp.bfloat16)
        k_bf = k.astype(jnp.bfloat16)
        v_bf = v.astype(jnp.bfloat16)

        # Query-axis tiling: each chunk keeps its (HW, QBLK) score/exp tile small.
        for ci in range(n_chunks):
            c0 = ci * QBLK
            qc = q_bf[:, c0:c0 + QBLK]                            # (CK, QBLK)

            # scores s[j, i] = <K[:, j], Qscaled[:, i]>  (keys on sublanes,
            # queries on lanes) -- dim-0 contraction, no explicit transpose.
            s = lax.dot_general(k_bf, qc, (((0,), (0,)), ((), ())),
                                preferred_element_type=jnp.float32)       # (HW, QBLK)

            # softmax over keys (axis 0); statistics in f32.
            m = jnp.max(s, axis=0, keepdims=True)                 # (1, QBLK)
            e = jnp.exp(s - m)                                    # (HW, QBLK) f32
            denom = jnp.sum(e, axis=0, keepdims=True)             # (1, QBLK) f32

            # deferred normalization: PV matmul on UNNORMALIZED e, then scale the
            # tiny (CV, QBLK) result with the EUP reciprocal (broadcast over sublanes).
            ao = jnp.dot(v_bf, e.astype(jnp.bfloat16),
                         preferred_element_type=jnp.float32)              # (CV, QBLK)
            ao = ao * pl.reciprocal(denom, approx=True)

            # output 1x1 conv (dim-0 contraction against wo^T) + bias + residual,
            # stored lane-dense.
            outc = lax.dot_general(wo_t, ao, (((0,), (0,)), ((), ())),
                                   preferred_element_type=jnp.float32)    # (C, QBLK)
            o_ref[0, :, c0:c0 + QBLK] = outc + bo + x1[:, c0:c0 + QBLK]

    return kernel


def cross_attention_conv(x1, x2, params):
    """x1, x2: (B, C, H, W) f32 (NCHW).  Returns (B, C, H, W) f32."""
    wq, bq, wk, bk, wv, bv, wo, bo = params
    B, C, H, W = x1.shape
    HW = H * W
    CK = wq.shape[0]
    CV = wv.shape[0]
    QBLK = 128 if HW % 128 == 0 else HW
    assert HW % QBLK == 0

    # Fold the attention scale into the query conv; pack all weights/biases into
    # two buffers so the kernel has only 4 inputs.
    scale = 1.0 / float(np.sqrt(CK))
    w_all = jnp.concatenate(
        [wq * scale, wk, wv, wo.T], axis=0).astype(jnp.float32)          # (2CK+2CV, C)
    b_all = jnp.concatenate(
        [bq * scale, bk, bv, bo], axis=0).reshape(-1, 1).astype(jnp.float32)  # (2CK+CV+C, 1)

    x1f = x1.reshape(B, C, HW).astype(jnp.float32)   # pure reshape, no transpose
    x2f = x2.reshape(B, C, HW).astype(jnp.float32)

    kernel = _make_kernel(C, CK, CV, HW, QBLK)

    out = pl.pallas_call(
        kernel,
        out_shape=jax.ShapeDtypeStruct((B, C, HW), jnp.float32),
        grid_spec=pltpu.PrefetchScalarGridSpec(
            num_scalar_prefetch=0,
            grid=(B,),
            in_specs=[
                pl.BlockSpec((1, C, HW), lambda n: (n, 0, 0)),            # x1
                pl.BlockSpec((1, C, HW), lambda n: (n, 0, 0)),            # x2
                pl.BlockSpec(tuple(w_all.shape), lambda n: (0, 0)),       # packed weights
                pl.BlockSpec(tuple(b_all.shape), lambda n: (0, 0)),       # packed biases
            ],
            out_specs=pl.BlockSpec((1, C, HW), lambda n: (n, 0, 0)),
        ),
        compiler_params=pltpu.CompilerParams(
            dimension_semantics=("parallel",)),
    )(x1f, x2f, w_all, b_all)
    return out.reshape(B, C, H, W)


# ----------------------------------- params ---------------------------------------

def init_cross_attention_params(key, in_channels, key_channels, value_channels):
    """Mirror nn.Conv2d(kernel_size=1) shapes/init; weights stored as (Cout, Cin)."""
    def conv1x1_init(k, cin, cout):
        kw, kb = jax.random.split(k)
        bound = 1.0 / np.sqrt(cin)          # fan_in = cin * 1 * 1
        w = jax.random.uniform(kw, (cout, cin), jnp.float32, -bound, bound)
        b = jax.random.uniform(kb, (cout,), jnp.float32, -bound, bound)
        return w, b

    kq, kk, kv, ko = jax.random.split(key, 4)
    wq, bq = conv1x1_init(kq, in_channels, key_channels)
    wk, bk = conv1x1_init(kk, in_channels, key_channels)      # encoder_mode=True
    wv, bv = conv1x1_init(kv, in_channels, value_channels)
    wo, bo = conv1x1_init(ko, value_channels, in_channels)
    return (wq, bq, wk, bk, wv, bv, wo, bo)


# ---------------------------------- reference --------------------------------------

def reference_forward_np(x1, x2, params):
    """Pure-numpy reference matching CrossAttentionConv.forward."""
    x1 = np.asarray(x1, np.float32)
    x2 = np.asarray(x2, np.float32)
    wq, bq, wk, bk, wv, bv, wo, bo = [np.asarray(p, np.float32) for p in params]
    B, C, H, W = x1.shape
    HW = H * W

    def conv1x1(x, w, b):
        xf = x.reshape(x.shape[0], x.shape[1], -1)               # (B, Cin, HW)
        return np.einsum('oc,bcp->bop', w, xf) + b[None, :, None]

    Q = conv1x1(x1, wq, bq)                                      # (B, Ck, HW)
    K = conv1x1(x2, wk, bk)                                      # (B, Ck, HW)
    V = conv1x1(x2, wv, bv)                                      # (B, Cv, HW)

    Qp = np.transpose(Q, (0, 2, 1))                              # (B, HW, Ck)
    attn = np.matmul(Qp, K) / np.sqrt(Qp.shape[-1])              # (B, HW, HW)
    attn = attn - attn.max(axis=-1, keepdims=True)
    attn = np.exp(attn)
    attn = attn / attn.sum(axis=-1, keepdims=True)

    attn_out = np.matmul(V, np.transpose(attn, (0, 2, 1)))       # (B, Cv, HW)
    out = np.einsum('ov,bvp->bop', wo, attn_out) + bo[None, :, None]
    return (out + x1.reshape(B, C, HW)).reshape(B, C, H, W)


# ------------------------------------- main -----------------------------------------

if __name__ == "__main__":
    B, C, H, W = 2, 4, 16, 16          # in_channels=4
    Ck, Cv = 8, 8                      # key_channels=8, value_channels=8

    key = jax.random.PRNGKey(0)
    key, k1, k2 = jax.random.split(key, 3)
    x1 = jax.random.normal(k1, (B, C, H, W), jnp.float32)
    x2 = jax.random.normal(k2, (B, C, H, W), jnp.float32)
    params = init_cross_attention_params(key, C, Ck, Cv)

    out = cross_attention_conv(x1, x2, params)
    out = jax.block_until_ready(out)
    assert out.shape == (B, C, H, W), out.shape

    ref = reference_forward_np(np.asarray(x1), np.asarray(x2),
                               [np.asarray(p) for p in params])
    # Tolerance accounts for bf16 MXU operands on QK^T / PV and approx reciprocal.
    np.testing.assert_allclose(np.asarray(out), ref, rtol=2e-2, atol=2e-2)

    print("KERNEL_OK")
</pallas_src>

<mosaic_0001>
module attributes {stable_mosaic.version = 11 : i64} {
  func.func @kernel(%arg0: i32, %arg1: memref<1x4x256xf32, #tpu.memory_space<vmem>>, %arg2: memref<1x4x256xf32, #tpu.memory_space<vmem>>, %arg3: memref<32x4xf32, #tpu.memory_space<vmem>>, %arg4: memref<28x1xf32, #tpu.memory_space<vmem>>, %arg5: memref<1x4x256xf32, #tpu.memory_space<vmem>>) attributes {dimension_semantics = [#tpu.dimension_semantics<parallel>], iteration_bounds = array<i64: 2>, scalar_prefetch = 0 : i64, scratch_operands = 0 : i64, tpu.core_type = #tpu.core_type<tc>, window_params = [{transform_indices = @transform_0, window_bounds = array<i64: 1, 4, 256>}, {transform_indices = @transform_1, window_bounds = array<i64: 1, 4, 256>}, {pipeline_mode = #tpu.pipeline_mode<synchronous>, transform_indices = @transform_2, window_bounds = array<i64: 32, 4>}, {pipeline_mode = #tpu.pipeline_mode<synchronous>, transform_indices = @transform_3, window_bounds = array<i64: 28, 1>}, {transform_indices = @transform_4, window_bounds = array<i64: 1, 4, 256>}]} {
    %c0 = arith.constant 0 : index
    %c0_0 = arith.constant 0 : index
    %c0_1 = arith.constant 0 : index
    %0 = vector.load %arg1[%c0, %c0_0, %c0_1] : memref<1x4x256xf32, #tpu.memory_space<vmem>>, vector<1x4x256xf32>
    %1 = vector.shape_cast %0 : vector<1x4x256xf32> to vector<4x256xf32>
    %c0_2 = arith.constant 0 : index
    %c0_3 = arith.constant 0 : index
    %c0_4 = arith.constant 0 : index
    %2 = vector.load %arg2[%c0_2, %c0_3, %c0_4] : memref<1x4x256xf32, #tpu.memory_space<vmem>>, vector<1x4x256xf32>
    %3 = vector.shape_cast %2 : vector<1x4x256xf32> to vector<4x256xf32>
    %c0_5 = arith.constant 0 : index
    %c0_6 = arith.constant 0 : index
    %4 = vector.load %arg3[%c0_5, %c0_6] : memref<32x4xf32, #tpu.memory_space<vmem>>, vector<8x4xf32>
    %c8 = arith.constant 8 : index
    %c0_7 = arith.constant 0 : index
    %5 = vector.load %arg3[%c8, %c0_7] : memref<32x4xf32, #tpu.memory_space<vmem>>, vector<16x4xf32>
    %c24 = arith.constant 24 : index
    %c0_8 = arith.constant 0 : index
    %6 = vector.load %arg3[%c24, %c0_8] : memref<32x4xf32, #tpu.memory_space<vmem>>, vector<8x4xf32>
    %c0_9 = arith.constant 0 : index
    %c0_10 = arith.constant 0 : index
    %7 = vector.load %arg4[%c0_9, %c0_10] : memref<28x1xf32, #tpu.memory_space<vmem>>, vector<8x1xf32>
    %c8_11 = arith.constant 8 : index
    %c0_12 = arith.constant 0 : index
    %8 = vector.load %arg4[%c8_11, %c0_12] : memref<28x1xf32, #tpu.memory_space<vmem>>, vector<16x1xf32>
    %c24_13 = arith.constant 24 : index
    %c0_14 = arith.constant 0 : index
    %9 = vector.load %arg4[%c24_13, %c0_14] : memref<28x1xf32, #tpu.memory_space<vmem>>, vector<4x1xf32>
    %cst = arith.constant dense<0.000000e+00> : vector<8x256xf32>
    %10 = tpu.matmul %4, %1, %cst {dimension_numbers = #tpu.dot_dimension_numbers<[1], [0], [0], [1], [0, 0, 1, 1], [], []>} : vector<8x4xf32>, vector<4x256xf32>, vector<8x256xf32> -> vector<8x256xf32>
    %11 = vector.broadcast %7 : vector<8x1xf32> to vector<8x256xf32>
    %12 = arith.addf %10, %11 : vector<8x256xf32>
    %cst_15 = arith.constant dense<0.000000e+00> : vector<16x256xf32>
    %13 = tpu.matmul %5, %3, %cst_15 {dimension_numbers = #tpu.dot_dimension_numbers<[1], [0], [0], [1], [0, 0, 1, 1], [], []>} : vector<16x4xf32>, vector<4x256xf32>, vector<16x256xf32> -> vector<16x256xf32>
    %14 = vector.broadcast %8 : vector<16x1xf32> to vector<16x256xf32>
    %15 = arith.addf %13, %14 : vector<16x256xf32>
    %16 = vector.extract_strided_slice %15 {offsets = [0, 0], sizes = [8, 256], strides = [1, 1]} : vector<16x256xf32> to vector<8x256xf32>
    %17 = vector.extract_strided_slice %15 {offsets = [8, 0], sizes = [8, 256], strides = [1, 1]} : vector<16x256xf32> to vector<8x256xf32>
    %18 = arith.truncf %12 : vector<8x256xf32> to vector<8x256xbf16>
    %19 = arith.truncf %16 : vector<8x256xf32> to vector<8x256xbf16>
    %20 = arith.truncf %17 : vector<8x256xf32> to vector<8x256xbf16>
    %21 = vector.extract_strided_slice %18 {offsets = [0, 0], sizes = [8, 128], strides = [1, 1]} : vector<8x256xbf16> to vector<8x128xbf16>
    %cst_16 = arith.constant dense<0.000000e+00> : vector<256x128xf32>
    %22 = tpu.matmul %19, %21, %cst_16 {dimension_numbers = #tpu.dot_dimension_numbers<[0], [0], [1], [1], [0, 1, 1, 1], [], []>} : vector<8x256xbf16>, vector<8x128xbf16>, vector<256x128xf32> -> vector<256x128xf32>
    %cst_17 = arith.constant dense<0xFF800000> : vector<128xf32>
    %23 = vector.multi_reduction <maximumf>, %22, %cst_17 [0] : vector<256x128xf32> to vector<128xf32>
    %24 = vector.shape_cast %23 : vector<128xf32> to vector<1x128xf32>
    %25 = vector.broadcast %24 : vector<1x128xf32> to vector<256x128xf32>
    %26 = arith.subf %22, %25 : vector<256x128xf32>
    %27 = math.exp %26 : vector<256x128xf32>
    %cst_18 = arith.constant dense<0.000000e+00> : vector<128xf32>
    %28 = vector.multi_reduction <add>, %27, %cst_18 [0] : vector<256x128xf32> to vector<128xf32>
    %29 = vector.shape_cast %28 : vector<128xf32> to vector<1x128xf32>
    %30 = arith.truncf %27 : vector<256x128xf32> to vector<256x128xbf16>
    %cst_19 = arith.constant dense<0.000000e+00> : vector<8x128xf32>
    %31 = tpu.matmul %20, %30, %cst_19 {dimension_numbers = #tpu.dot_dimension_numbers<[1], [0], [0], [1], [0, 0, 1, 1], [], []>} : vector<8x256xbf16>, vector<256x128xbf16>, vector<8x128xf32> -> vector<8x128xf32>
    %32 = tpu.reciprocal %29 {approx = true} : vector<1x128xf32> -> vector<1x128xf32>
    %33 = vector.broadcast %32 : vector<1x128xf32> to vector<8x128xf32>
    %34 = arith.mulf %31, %33 : vector<8x128xf32>
    %cst_20 = arith.constant dense<0.000000e+00> : vector<4x128xf32>
    %35 = tpu.matmul %6, %34, %cst_20 {dimension_numbers = #tpu.dot_dimension_numbers<[0], [0], [1], [1], [0, 1, 1, 1], [], []>} : vector<8x4xf32>, vector<8x128xf32>, vector<4x128xf32> -> vector<4x128xf32>
    %36 = vector.broadcast %9 : vector<4x1xf32> to vector<4x128xf32>
    %37 = arith.addf %35, %36 : vector<4x128xf32>
    %38 = vector.extract_strided_slice %1 {offsets = [0, 0], sizes = [4, 128], strides = [1, 1]} : vector<4x256xf32> to vector<4x128xf32>
    %39 = arith.addf %37, %38 : vector<4x128xf32>
    %c0_21 = arith.constant 0 : index
    %c0_22 = arith.constant 0 : index
    %c0_23 = arith.constant 0 : index
    %40 = vector.load %arg5[%c0_21, %c0_22, %c0_23] : memref<1x4x256xf32, #tpu.memory_space<vmem>>, vector<1x4x128xf32>
    %41 = vector.shape_cast %40 : vector<1x4x128xf32> to vector<4x128xf32>
    %42 = vector.shape_cast %39 : vector<4x128xf32> to vector<1x4x128xf32>
    tpu.vector_store %arg5[%c0_21, %c0_22, %c0_23], %42 {strides = array<i32>} : memref<1x4x256xf32, #tpu.memory_space<vmem>>, vector<1x4x128xf32>,
    %43 = vector.extract_strided_slice %18 {offsets = [0, 128], sizes = [8, 128], strides = [1, 1]} : vector<8x256xbf16> to vector<8x128xbf16>
    %cst_24 = arith.constant dense<0.000000e+00> : vector<256x128xf32>
    %44 = tpu.matmul %19, %43, %cst_24 {dimension_numbers = #tpu.dot_dimension_numbers<[0], [0], [1], [1], [0, 1, 1, 1], [], []>} : vector<8x256xbf16>, vector<8x128xbf16>, vector<256x128xf32> -> vector<256x128xf32>
    %cst_25 = arith.constant dense<0xFF800000> : vector<128xf32>
    %45 = vector.multi_reduction <maximumf>, %44, %cst_25 [0] : vector<256x128xf32> to vector<128xf32>
    %46 = vector.shape_cast %45 : vector<128xf32> to vector<1x128xf32>
    %47 = vector.broadcast %46 : vector<1x128xf32> to vector<256x128xf32>
    %48 = arith.subf %44, %47 : vector<256x128xf32>
    %49 = math.exp %48 : vector<256x128xf32>
    %cst_26 = arith.constant dense<0.000000e+00> : vector<128xf32>
    %50 = vector.multi_reduction <add>, %49, %cst_26 [0] : vector<256x128xf32> to vector<128xf32>
    %51 = vector.shape_cast %50 : vector<128xf32> to vector<1x128xf32>
    %52 = arith.truncf %49 : vector<256x128xf32> to vector<256x128xbf16>
    %cst_27 = arith.constant dense<0.000000e+00> : vector<8x128xf32>
    %53 = tpu.matmul %20, %52, %cst_27 {dimension_numbers = #tpu.dot_dimension_numbers<[1], [0], [0], [1], [0, 0, 1, 1], [], []>} : vector<8x256xbf16>, vector<256x128xbf16>, vector<8x128xf32> -> vector<8x128xf32>
    %54 = tpu.reciprocal %51 {approx = true} : vector<1x128xf32> -> vector<1x128xf32>
    %55 = vector.broadcast %54 : vector<1x128xf32> to vector<8x128xf32>
    %56 = arith.mulf %53, %55 : vector<8x128xf32>
    %cst_28 = arith.constant dense<0.000000e+00> : vector<4x128xf32>
    %57 = tpu.matmul %6, %56, %cst_28 {dimension_numbers = #tpu.dot_dimension_numbers<[0], [0], [1], [1], [0, 1, 1, 1], [], []>} : vector<8x4xf32>, vector<8x128xf32>, vector<4x128xf32> -> vector<4x128xf32>
    %58 = vector.broadcast %9 : vector<4x1xf32> to vector<4x128xf32>
    %59 = arith.addf %57, %58 : vector<4x128xf32>
    %60 = vector.extract_strided_slice %1 {offsets = [0, 128], sizes = [4, 128], strides = [1, 1]} : vector<4x256xf32> to vector<4x128xf32>
    %61 = arith.addf %59, %60 : vector<4x128xf32>
    %c0_29 = arith.constant 0 : index
    %c0_30 = arith.constant 0 : index
    %c128 = arith.constant 128 : index
    %62 = vector.load %arg5[%c0_29, %c0_30, %c128] : memref<1x4x256xf32, #tpu.memory_space<vmem>>, vector<1x4x128xf32>
    %63 = vector.shape_cast %62 : vector<1x4x128xf32> to vector<4x128xf32>
    %64 = vector.shape_cast %61 : vector<4x128xf32> to vector<1x4x128xf32>
    tpu.vector_store %arg5[%c0_29, %c0_30, %c128], %64 {strides = array<i32>} : memref<1x4x256xf32, #tpu.memory_space<vmem>>, vector<1x4x128xf32>,
    return
  }
  func.func @transform_0(%arg0: i32) -> (i32, i32, i32) {
    %c0_i32 = arith.constant 0 : i32
    %c0_i32_0 = arith.constant 0 : i32
    %c0_i32_1 = arith.constant 0 : i32
    return %arg0, %c0_i32, %c0_i32_0 : i32, i32, i32
  }
  func.func @transform_1(%arg0: i32) -> (i32, i32, i32) {
    %c0_i32 = arith.constant 0 : i32
    %c0_i32_0 = arith.constant 0 : i32
    %c0_i32_1 = arith.constant 0 : i32
    return %arg0, %c0_i32, %c0_i32_0 : i32, i32, i32
  }
  func.func @transform_2(%arg0: i32) -> (i32, i32) {
    %c0_i32 = arith.constant 0 : i32
    %c0_i32_0 = arith.constant 0 : i32
    %c0_i32_1 = arith.constant 0 : i32
    return %c0_i32, %c0_i32_0 : i32, i32
  }
  func.func @transform_3(%arg0: i32) -> (i32, i32) {
    %c0_i32 = arith.constant 0 : i32
    %c0_i32_0 = arith.constant 0 : i32
    %c0_i32_1 = arith.constant 0 : i32
    return %c0_i32, %c0_i32_0 : i32, i32
  }
  func.func @transform_4(%arg0: i32) -> (i32, i32, i32) {
    %c0_i32 = arith.constant 0 : i32
    %c0_i32_0 = arith.constant 0 : i32
    %c0_i32_1 = arith.constant 0 : i32
    return %arg0, %c0_i32, %c0_i32_0 : i32, i32, i32
  }
}

</mosaic_0001>

<bundles_post_ra>
// kernel: tpu_custom_call.1
= control target key start
LH: loop header
LB: loop body
LE: loop exit
PB: predicated region body
PF: predicated region fallthrough
CT: control target
= control target key end

     0   :  { %9 = vsyncpa [#allocation3], 0  ;;  %s2264_s0 = inlined_call_operand.vmem [shape: f32[2,4,256], index: 0, kind: input, shape index: {}]   ;;  %s2265_s1 = inlined_call_operand.vmem [shape: f32[2,4,256], index: 1, kind: input, shape index: {}]   ;;  %s2266_s2 = inlined_call_operand.vmem [shape: f32[32,4], index: 2, kind: input, shape index: {}]   ;;  %s2267_s3 = inlined_call_operand.vmem [shape: f32[28,1], index: 3, kind: input, shape index: {}]   ;;  %s2268_s4 = inlined_call_operand.hbm [shape: f32[2,4,256], index: 4, kind: output, shape index: {}]  }
   0x1   :  { %11 = vsyncpa [#allocation3 + $0x1], 0  ;;  %s1552_s15 = smov 0   ;;  %s1554_s16 = smov 0  }
   0x2   :  { %s1556_s17 = smov 0   ;;  %s1558_s18 = smov 0  }
   0x3 LB: > { %s1573_s19 = sadd.s32 4294967295, %s1524_s18   ;;  %s1223_s20 = sadd.s32 4294967294, %s1524_s18   ;;  %s1524_s18 = sphi %s1558_s18, %s2291_s18   ;;  %s1520_s17 = sphi %s1556_s17, %s2290_s17   ;;  %s1516_s16 = sphi %s1554_s16, %s2289_s16   ;;  %s1512_s15 = sphi %s1552_s15, %s2288_s15  }
   0x4   : > { %s1577_s21 = sadd.s32 1, %s1524_s18   ;;  %s118_s22 = sadd.s32 1, %s1520_s17 }
   0x5   : > { %s115_s23 = ssub.s32 %s1524_s18, %s1577_s21  ;;  %p128_p0 = scmp.ne.s32.totalorder %s1520_s17, %s1516_s16 }
   0x6   : > { %p116_p1 = scmp.eq.s32.totalorder %s115_s23, 0  ;;  %p129_p2 = scmp.eq.s32.totalorder %s1573_s19, 1 }
   0x7   : > { %p134_p3 = scmp.ne.s32.totalorder %s1516_s16, %s1512_s15  ;;  %p135_p4 = scmp.eq.s32.totalorder %s1223_s20, 1 }
   0x8   : > { %s1588_s24 = scalar_select %p116_p1, %s1520_s17, %s118_s22  }
   0x9   : > { %p1590_p5 = por %p129_p2, %p128_p0  ;;  %p1594_p6 = por %p135_p4, %p134_p3 }
   0xa   : > { %p1226_p7 = scmp.ge.s32.totalorder %s1524_s18, 1  ;;  %p175_p8 = scmp.lt.s32.totalorder %s1524_s18, 3 }
   0xc   : > { %p176_p9 = pnand %p1226_p7, %p175_p8 }
   0xe   : > { %179 = sbr.rel (%p176_p9) target bundleno = 1507 (0x5e3), region = 36 }
  0x13   : > { %p206_p10 = scmp.lt.s32.totalorder %s1573_s19, 1  ;;  %v2269_v0 = vmov 0   ;;  %v224_v1 = vld [vmem:[%s2267_s3 + $0x8] sm:$0xff]  ;;  %v223_v3 = vld [vmem:[%s2267_s3] sm:$0xff]  ;;  %vm240_vm0 = vcmask 1043456   ;;  %vm236_vm1 = vcmask 31744  }
  0x14   : > { %1327 = vset.pattern.permute.xlu0 %v2269_v0  ;;  %v219_v5 = vld [vmem:[%s2266_s2] sm:$0xff]  ;;  %v220_v8 = vld [vmem:[%s2266_s2 + $0x8] sm:$0xff]  ;;  %vm384_vm2 = vcmask 64512   ;;  %v221_v26 = vld [vmem:[%s2266_s2 + $0x10] sm:$0xff]  ;;  %s203_s8 = sand.u32 1, %s1516_s16   ;;  %s1283_s11 = sshll.u32 %s1573_s19, 3 }
  0x15   : > { %s207_s29 = scalar_select %p206_p10, %s1573_s19, 1  ;;  %287 = vperm.xlu0 %1327, %v224_v1   ;;  %v225_v32 = vld [vmem:[%s2267_s3 + $0x10] sm:$0xff] }
  0x16   : > { %s1227_s9 = sshll.u32 %s203_s8, 3  ;;  %s1147_s14 = scalar_lea.hbm %s2268_s4, %s1283_s11 }
  0x17   : > { %s1281_s30 = sshll.u32 %s207_s29, 3  ;;  %s1999_s10 = scalar_lea.vmem [#allocation2], %s1227_s9 }
  0x18   : > { %s210_s7 = scalar_lea.vmem %s2264_s0, %s1281_s30  ;;  %s215_s12 = scalar_lea.vmem %s2265_s1, %s1281_s30 }
  0x19   : > { %v1609_v2 = vld [vmem:[%s210_s7] sm:$0xff]  ;;  %s1149_s20 = sshll.u32 %s1999_s10, 4  ;;  %s1151_s22 = sshll.u32 %s1147_s14, 4  ;;  %s1150_s20 = int_to_ptr.vmem [resolvable:$true] %s1149_s20  ;;  %s1152_s22 = int_to_ptr.hbm [resolvable:$true] %s1151_s22 }
  0x1a   : > { %2277 = vst [vmem:[#allocation5_spill] sm:$0xff] %v1609_v2  ;;  %v218_v4 = vld [vmem:[%s215_s12] sm:$0xff]  ;;  %s1136_s23 = scalar_lea.sflag [#allocation3], %s203_s8  ;;  %s1476_s27 = sshra.s32 %s1152_s22, 4  ;;  %s1477_s27 = int_to_ptr.hbm [resolvable:$true] %s1476_s27 }
  0x1b   : > { %233 = vst [vmem:[#allocation1] ss:$2 sm:$0xff] %v1609_v2  ;;  %s1478_s19 = scalar_lea.hbm %s1477_s27, 8  ;;  %s1482_s30 = scalar_lea.hbm %s2268_s4, 16 }
  0x1c   : > { %p1479_p11 = scmp.ne.s32.totalorder %s1477_s27, %s1478_s19  ;;  %p1483_p0 = scmp.lt.s32.totalorder %s1477_s27, %s2268_s4 }
  0x1d   : > { %229 = vperm.xlu0 %1327, %v223_v3   ;;  %p1484_p1 = scmp.lt.s32.totalorder %s1482_s30, %s1478_s19 }
  0x1e   : > { %p1480_p12 = pnand %p1479_p11, %p1590_p5 }
  0x1f   : > { %p1485_p2 = por %p1484_p1, %p1483_p0 }
  0x20   : > { %p1481_p13 = pneg %p1480_p12 }
  0x22   : > { %v235_v6 = vld.sshfl [vmem:[#allocation1 + $0x8] sm:$0xff pattern:$0x75316420]  ;;  %v234_v7 = vld.sshfl [vmem:[#allocation1] sm:$0xff pattern:$0x75316420]  ;;  %p1486_p3 = pnand %p1485_p2, %p1481_p13 }
  0x23   : > { %1234 = vmatpush.msk.msra.mxu2 %vm240_vm0, %v235_v6  ;;  %1232 = vmatpush.msk.msra.mxu0 %vm240_vm0, %v234_v7  ;;  %296 = vst [vmem:[#allocation1] ss:$2 sm:$0xff] %v218_v4 }
  0x24   : > { %1235 = vmatmul.msk.f32.vlgmr.msra.gmra.mxu2 %vm236_vm1, %v219_v5  ;;  %1233 = vmatmul.msk.f32.vlgmr.msra.gmra.mxu0 %vm236_vm1, %v219_v5 }
  0x2a   : > { %v297_v9 = vld.sshfl [vmem:[#allocation1] sm:$0xff pattern:$0x75316420]  ;;  %v298_v10 = vld.sshfl [vmem:[#allocation1 + $0x8] sm:$0xff pattern:$0x75316420] }
  0x2b   : > { %1236 = vmatpush.msk.msrb.mxu2 %vm240_vm0, %v297_v9  ;;  %1239 = vmatpush.msk.msra.mxu1 %vm240_vm0, %v298_v10  ;;  %1130 = vst [vmem:[#allocation1] ss:$2 sm:$0xff] %v1609_v2 }
  0x2c   : > { %1237 = vmatmul.msk.f32.vlgmr.msrb.gmra.mxu2 %vm236_vm1, %v220_v8  ;;  %1240 = vmatmul.msk.f32.vlgmr.msra.gmra.mxu1 %vm236_vm1, %v220_v8 }
  0x34   : > { %1241 = vmatmul.msk.f32.gmra.mxu1 %vm236_vm1, %v221_v26  ;;  %1238 = vmatmul.msk.f32.gmra.mxu2 %vm236_vm1, %v221_v26 }
  0x87   : > { %v288_v11 = vpop.permute.xlu0 %287 }
  0x8f   : > { %v230_v12 = vpop.permute.xlu0 %229 }
  0xa1   : > { %v262_v13 = vpop.f32.mrf.mxu0 }
  0xa2   : > { %v263_v14 = vadd.f32 %v262_v13, %v230_v12 }
  0xa7   : > { %v282_v15 = vpop.f32.mrf.mxu2 }
  0xa8   : > { %v283_v16 = vadd.f32 %v282_v15, %v230_v12 }
  0xa9   : > { %v349_v17 = vpop.f32.mrf.mxu1 }
  0xaa   : > { %v1633_v18 = vpack.c.bf16 %v283_v16, %v263_v14  ;;  %v350_v20 = vadd.f32 %v349_v17, %v288_v11 }
  0xac   : > { %v434_v19 = vsel %vm240_vm0, %v1633_v18, 0  ;;  %v357_v23 = vpack.c.bf16 %v350_v20, %v350_v20 }
  0xad   : > { %443 = vmatpush.bf16.msrb.mxu0 %v434_v19  ;;  %1284 = vmatpush.bf16.msrb.mxu1 %v434_v19 }
  0xaf   : > { %v326_v21 = vpop.f32.mrf.mxu2 }
  0xb0   : > { %v327_v22 = vadd.f32 %v326_v21, %v288_v11 }
  0xb1   : > { %v1720_v48 = vpop.f32.mrf.mxu1 }
  0xb2   : > { %v356_v24 = vpack.c.bf16 %v327_v22, %v327_v22 }
  0xb4   : > { %360 = vxpose.binary.xlu1.c.b16.start.end [1/2] (short) %v357_v23, %v356_v24, 128 }
 0x107   : > { %1328 = vset.pattern.permute.xlu1 %v2269_v0 }
 0x160   : > { %v1638_v25 = vpop.trf.xlu1 }
 0x161   : > { %1242 = vmatmul.msk.bf16.vlgmr.msrb.gmra.mxu0 %vm384_vm2, %v1638_v25 }
 0x168   : > { %v1647_v27 = vpop.trf.xlu1 }
 0x170   : > { %v1649_v28 = vpop.trf.xlu1 }
 0x171   : > { %1243 = vmatmul.msk.bf16.gmra.mxu0 %vm384_vm2, %v1649_v28 }
 0x178   : > { %v1653_v29 = vpop.trf.xlu1 }
 0x17e   : > { %292 = vperm.xlu1 %1328, %v225_v32  }
 0x180   : > { %v1655_v30 = vpop.trf.xlu1 }
 0x181   : > { %1244 = vmatmul.msk.bf16.gmra.mxu0 %vm384_vm2, %v1655_v30 }
 0x188   : > { %v1659_v31 = vpop.trf.xlu1 }
 0x189   : > { %1252 = vmatmul.msk.bf16.vlgmr.msrb.gmra.mxu1 %vm384_vm2, %v1659_v31 }
 0x190   : > { %v1666_v33 = vpop.trf.xlu1 }
 0x191   : > { %1245 = vmatmul.msk.bf16.gmra.mxu0 %vm384_vm2, %v1666_v33 }
 0x198   : > { %v1670_v34 = vpop.trf.xlu1 }
 0x199   : > { %1253 = vmatmul.msk.bf16.gmra.mxu1 %vm384_vm2, %v1670_v34 }
 0x1a0   : > { %v1674_v35 = vpop.trf.xlu1 }
 0x1a1   : > { %1246 = vmatmul.msk.bf16.gmra.mxu0 %vm384_vm2, %v1674_v35 }
 0x1a8   : > { %v1678_v36 = vpop.trf.xlu1 }
 0x1a9   : > { %2278 = vst [vmem:[#allocation6_spill] sm:$0xff] %v1678_v36  ;;  %1254 = vmatmul.msk.bf16.gmra.mxu1 %vm384_vm2, %v1678_v36 }
 0x1b0   : > { %v1682_v37 = vpop.trf.xlu1 }
 0x1b1   : > { %1247 = vmatmul.msk.bf16.gmra.mxu0 %vm384_vm2, %v1682_v37 }
 0x1b8   : > { %v1686_v38 = vpop.trf.xlu1 }
 0x1b9   : > { %2279 = vst [vmem:[#allocation7_spill] sm:$0xff] %v1686_v38  ;;  %1255 = vmatmul.msk.bf16.gmra.mxu1 %vm384_vm2, %v1686_v38 }
 0x1c0   : > { %v1690_v39 = vpop.trf.xlu1 }
 0x1c1   : > { %1248 = vmatmul.msk.bf16.gmra.mxu0 %vm384_vm2, %v1690_v39 }
 0x1c8   : > { %v1694_v40 = vpop.trf.xlu1 }
 0x1c9   : > { %2280 = vst [vmem:[#allocation8_spill] sm:$0xff] %v1694_v40  ;;  %1256 = vmatmul.msk.bf16.gmra.mxu1 %vm384_vm2, %v1694_v40 }
 0x1d0   : > { %v1698_v41 = vpop.trf.xlu1 }
 0x1d1   : > { %1249 = vmatmul.msk.bf16.gmra.mxu0 %vm384_vm2, %v1698_v41 }
 0x1d8   : > { %v1702_v42 = vpop.trf.xlu1 }
 0x1d9   : > { %2281 = vst [vmem:[#allocation9_spill] sm:$0xff] %v1702_v42  ;;  %1257 = vmatmul.msk.bf16.gmra.mxu1 %vm384_vm2, %v1702_v42 }
 0x1de   : > { %v1706_v43 = vpop.f32.mrf.mxu0 }
 0x1e1   : > { %1250 = vmatmul.msk.bf16.gmra.mxu0 %vm384_vm2, %v1647_v27 }
 0x1e6   : > { %v1710_v44 = vpop.f32.mrf.mxu0 }
 0x1ee   : > { %v1712_v45 = vpop.f32.mrf.mxu0 }
 0x1f1   : > { %1251 = vmatmul.msk.bf16.gmra.mxu0 %vm384_vm2, %v1653_v29 }
 0x1f6   : > { %v1716_v46 = vpop.f32.mrf.mxu0 }
 0x1fe   : > { %v1718_v47 = vpop.f32.mrf.mxu0 }
 0x1ff   : > { %v525_v11 = vmax.f32 %v1706_v43, %v1718_v47 }
 0x206   : > { %v1722_v49 = vpop.f32.mrf.mxu0  ;;  %v1726_v51 = vpop.f32.mrf.mxu1 }
 0x207   : > { %v526_v9 = vmax.f32 %v1710_v44, %v1722_v49 }
 0x20e   : > { %v1724_v50 = vpop.f32.mrf.mxu0  ;;  %v1730_v53 = vpop.f32.mrf.mxu1 }
 0x20f   : > { %v527_v12 = vmax.f32 %v1712_v45, %v1724_v50 }
 0x216   : > { %v1728_v52 = vpop.f32.mrf.mxu0  ;;  %v1734_v55 = vpop.f32.mrf.mxu1 }
 0x217   : > { %v528_v22 = vmax.f32 %v1716_v46, %v1728_v52 }
 0x21e   : > { %v1732_v54 = vpop.f32.mrf.mxu0  ;;  %v1738_v57 = vpop.f32.mrf.mxu1 }
 0x21f   : > { %v529_v14 = vmax.f32 %v525_v11, %v1732_v54 }
 0x226   : > { %v1736_v56 = vpop.f32.mrf.mxu0  ;;  %v1744_v60 = vpop.f32.mrf.mxu1 }
 0x227   : > { %v530_v13 = vmax.f32 %v526_v9, %v1736_v56 }
 0x22e   : > { %v1740_v58 = vpop.f32.mrf.mxu0  ;;  %v1748_v62 = vpop.f32.mrf.mxu1 }
 0x22f   : > { %v531_v15 = vmax.f32 %v527_v12, %v1740_v58 }
 0x236   : > { %v1742_v59 = vpop.f32.mrf.mxu0  ;;  %v1752_v1 = vpop.f32.mrf.mxu1 }
 0x237   : > { %v532_v32 = vmax.f32 %v528_v22, %v1742_v59 }
 0x23e   : > { %v1746_v61 = vpop.f32.mrf.mxu0  ;;  %v1756_v4 = vpop.f32.mrf.mxu1 }
 0x23f   : > { %v533_v19 = vmax.f32 %v529_v14, %v1746_v61 }
 0x246   : > { %v1750_v63 = vpop.f32.mrf.mxu0  ;;  %v1762_v7 = vpop.f32.mrf.mxu1 }
 0x247   : > { %v534_v16 = vmax.f32 %v530_v13, %v1750_v63 }
 0x24e   : > { %v1754_v3 = vpop.f32.mrf.mxu0  ;;  %v1768_v10 = vpop.f32.mrf.mxu1 }
 0x24f   : > { %v535_v20 = vmax.f32 %v531_v15, %v1754_v3 }
 0x256   : > { %v1758_v5 = vpop.f32.mrf.mxu0  ;;  %v1787_v26 = vpop.f32.mrf.mxu1 }
 0x257   : > { %v536_v11 = vmax.f32 %v532_v32, %v1758_v5 }
 0x25e   : > { %v1760_v6 = vpop.f32.mrf.mxu0  ;;  %v1803_v0 = vpop.f32.mrf.mxu1 }
 0x25f   : > { %v537_v23 = vmax.f32 %v533_v19, %v1760_v6 }
 0x261   : > { %v541_v12 = vmax.f32 %v537_v23, %v1726_v51 }
 0x263   : > { %v545_v19 = vmax.f32 %v541_v12, %v1744_v60 }
 0x265   : > { %v549_v23 = vmax.f32 %v545_v19, %v1762_v7 }
 0x266   : > { %v1764_v8 = vpop.f32.mrf.mxu0 }
 0x267   : > { %v538_v21 = vmax.f32 %v534_v16, %v1764_v8 }
 0x269   : > { %v542_v9 = vmax.f32 %v538_v21, %v1730_v53 }
 0x26b   : > { %v546_v15 = vmax.f32 %v542_v9, %v1748_v62 }
 0x26d   : > { %v550_v21 = vmax.f32 %v546_v15, %v1768_v10 }
 0x26e   : > { %v1778_v17 = vpop.f32.mrf.mxu0 }
 0x26f   : > { %v539_v24 = vmax.f32 %v535_v20, %v1778_v17  ;;  %v553_v42 = vmax.f32 %v549_v23, %v550_v21 }
 0x271   : > { %v543_v13 = vmax.f32 %v539_v24, %v1734_v55 }
 0x273   : > { %v547_v20 = vmax.f32 %v543_v13, %v1752_v1 }
 0x275   : > { %v551_v24 = vmax.f32 %v547_v20, %v1787_v26 }
 0x276   : > { %v1794_v14 = vpop.f32.mrf.mxu0 }
 0x277   : > { %v540_v16 = vmax.f32 %v536_v11, %v1794_v14 }
 0x279   : > { %v544_v22 = vmax.f32 %v540_v16, %v1738_v57 }
 0x27b   : > { %v548_v32 = vmax.f32 %v544_v22, %v1756_v4 }
 0x27d   : > { %v552_v9 = vmax.f32 %v548_v32, %v1803_v0 }
 0x27f   : > { %v554_v11 = vmax.f32 %v551_v24, %v552_v9 }
 0x281   : > { %v555_v40 = vmax.f32 %v553_v42, %v554_v11 }
 0x283   : > { %v556_v12 = vrot.slane %v555_v40, 4 }
 0x285   : > { %v557_v2 = vmax.f32 %v555_v40, %v556_v12 }
 0x287   : > { %v558_v13 = vrot.slane %v557_v2, 2 }
 0x289   : > { %v559_v38 = vmax.f32 %v557_v2, %v558_v13 }
 0x28b   : > { %v560_v16 = vrot.slane %v559_v38, 1 }
 0x28d   : > { %v1808_v36 = vmax.f32 %v559_v38, %v560_v16 }
 0x28f   : > { %v562_v15 = vsub.f32 %v1706_v43, %v1808_v36  ;;  %v563_v19 = vsub.f32 %v1710_v44, %v1808_v36  ;;  %v564_v20 = vsub.f32 %v1712_v45, %v1808_v36  ;;  %v565_v22 = vsub.f32 %v1716_v46, %v1808_v36 }
 0x290   : > { %v566_v40 = vsub.f32 %v1718_v47, %v1808_v36  ;;  %v567_v2 = vsub.f32 %v1722_v49, %v1808_v36  ;;  %v568_v42 = vsub.f32 %v1724_v50, %v1808_v36  ;;  %v569_v44 = vsub.f32 %v1728_v52, %v1808_v36 }
 0x291   : > { %v594_v38 = vmul.f32 1.442695, %v562_v15  ;;  %v596_v43 = vmul.f32 1.442695, %v563_v19  ;;  %v598_v21 = vmul.f32 1.442695, %v564_v20  ;;  %v570_v46 = vsub.f32 %v1732_v54, %v1808_v36 }
 0x292   : > { %v600_v45 = vmul.f32 1.442695, %v565_v22  ;;  %v602_v32 = vmul.f32 1.442695, %v566_v40  ;;  %v571_v47 = vsub.f32 %v1736_v56, %v1808_v36  ;;  %v604_v49 = vmul.f32 1.442695, %v567_v2 }
 0x293   : > { %1330 = vpow2.f32 %v594_v38  ;;  %v572_v23 = vsub.f32 %v1740_v58, %v1808_v36  ;;  %v606_v50 = vmul.f32 1.442695, %v568_v42  ;;  %v574_v24 = vsub.f32 %v1746_v61, %v1808_v36 }
 0x294   : > { %1332 = vpow2.f32 %v596_v43  ;;  %v608_v52 = vmul.f32 1.442695, %v569_v44  ;;  %v575_v9 = vsub.f32 %v1750_v63, %v1808_v36  ;;  %v610_v54 = vmul.f32 1.442695, %v570_v46 }
 0x295   : > { %1334 = vpow2.f32 %v598_v21  ;;  %v576_v56 = vsub.f32 %v1754_v3, %v1808_v36  ;;  %v612_v12 = vmul.f32 1.442695, %v571_v47  ;;  %v577_v13 = vsub.f32 %v1758_v5, %v1808_v36 }
 0x296   : > { %1336 = vpow2.f32 %v600_v45  ;;  %v614_v61 = vmul.f32 1.442695, %v572_v23  ;;  %v578_v16 = vsub.f32 %v1760_v6, %v1808_v36  ;;  %v618_v63 = vmul.f32 1.442695, %v574_v24 }
 0x297   : > { %1338 = vpow2.f32 %v602_v32  ;;  %v579_v3 = vsub.f32 %v1764_v8, %v1808_v36  ;;  %v620_v20 = vmul.f32 1.442695, %v575_v9  ;;  %v580_v5 = vsub.f32 %v1778_v17, %v1808_v36 }
 0x298   : > { %1340 = vpow2.f32 %v604_v49  ;;  %v622_v40 = vmul.f32 1.442695, %v576_v56  ;;  %v581_v38 = vsub.f32 %v1794_v14, %v1808_v36  ;;  %v624_v42 = vmul.f32 1.442695, %v577_v13 }
 0x299   : > { %v1836_v11 = vpop.eup %1330  ;;  %1342 = vpow2.f32 %v606_v50  ;;  %v626_v8 = vmul.f32 1.442695, %v578_v16  ;;  %v573_v17 = vsub.f32 %v1742_v59, %v1808_v36  ;;  %v628_v45 = vmul.f32 1.442695, %v579_v3 }
 0x29a   : > { %v1840_v58 = vpop.eup %1332  ;;  %1344 = vpow2.f32 %v608_v52  ;;  %v630_v32 = vmul.f32 1.442695, %v580_v5  ;;  %v632_v49 = vmul.f32 1.442695, %v581_v38  ;;  %v593_v5 = vsub.f32 %v1803_v0, %v1808_v36 }
 0x29b   : > { %v658_v15 = vadd.f32 %v1840_v58, %v1836_v11  ;;  %v1848_v19 = vpop.eup %1334  ;;  %1346 = vpow2.f32 %v610_v54  ;;  %v616_v52 = vmul.f32 1.442695, %v573_v17  ;;  %v590_v38 = vsub.f32 %v1762_v7, %v1808_v36 }
 0x29c   : > { %v1852_v22 = vpop.eup %1336  ;;  %1348 = vpow2.f32 %v612_v12  ;;  %v588_v7 = vsub.f32 %v1752_v1, %v1808_v36  ;;  %v586_v1 = vsub.f32 %v1744_v60, %v1808_v36 }
 0x29d   : > { %v659_v6 = vadd.f32 %v1848_v19, %v658_v15  ;;  %v1857_v2 = vpop.eup %1338  ;;  %1350 = vpow2.f32 %v614_v61  ;;  %v222_v61 = vld [vmem:[%s2266_s2 + $0x18] sm:$0xff]  ;;  %v592_v15 = vsub.f32 %v1787_v26, %v1808_v36  ;;  %v591_v26 = vsub.f32 %v1768_v10, %v1808_v36 }
 0x29e   : > { %v1861_v43 = vpop.eup %1340  ;;  %1352 = vpow2.f32 %v618_v63  ;;  %744 = vxpose.xlu2.b32.start.end [1/1] (short) (narrow) %v222_v61, 8  ;;  %v582_v10 = vsub.f32 %v1726_v51, %v1808_v36  ;;  %v642_v60 = vmul.f32 1.442695, %v586_v1 }
 0x29f   : > { %v660_v21 = vadd.f32 %v1852_v22, %v659_v6  ;;  %v1864_v44 = vpop.eup %1342  ;;  %1354 = vpow2.f32 %v620_v20  ;;  %v654_v17 = vmul.f32 1.442695, %v592_v15  ;;  %v646_v15 = vmul.f32 1.442695, %v588_v7 }
 0x2a0   : > { %v1868_v46 = vpop.eup %1344  ;;  %1356 = vpow2.f32 %v622_v40  ;;  %v634_v51 = vmul.f32 1.442695, %v582_v10  ;;  %v697_v7 = vpack.c.bf16 %v1861_v43, %v1857_v2  ;;  %v293_v10 = vpop.permute.xlu1 %292 }
 0x2a1   : > { %v661_v14 = vadd.f32 %v1857_v2, %v660_v21  ;;  %v1871_v47 = vpop.eup %1346  ;;  %1358 = vpow2.f32 %v624_v42 }
 0x2a2   : > { %v1873_v23 = vpop.eup %1348  ;;  %1360 = vpow2.f32 %v626_v8 }
 0x2a3   : > { %v662_v50 = vadd.f32 %v1861_v43, %v661_v14  ;;  %v1351_v24 = vpop.eup %1350  ;;  %1362 = vpow2.f32 %v628_v45  ;;  %v656_v14 = vmul.f32 1.442695, %v593_v5 }
 0x2a4   : > { %v1353_v59 = vpop.eup %1352  ;;  %1364 = vpow2.f32 %v630_v32 }
 0x2a5   : > { %v663_v9 = vadd.f32 %v1864_v44, %v662_v50  ;;  %v1355_v54 = vpop.eup %1354  ;;  %1366 = vpow2.f32 %v632_v49  ;;  %v650_v50 = vmul.f32 1.442695, %v590_v38 }
 0x2a6   : > { %v1357_v56 = vpop.eup %1356  ;;  %1368 = vpow2.f32 %v616_v52  ;;  %v701_v45 = vpack.c.bf16 %v1355_v54, %v1353_v59  ;;  %v589_v52 = vsub.f32 %v1756_v4, %v1808_v36  ;;  %v587_v4 = vsub.f32 %v1748_v62, %v1808_v36 }
 0x2a7   : > { %v664_v12 = vadd.f32 %v1868_v46, %v663_v9  ;;  %v1359_v13 = vpop.eup %1358  ;;  %v652_v9 = vmul.f32 1.442695, %v591_v26  ;;  %1370 = vpow2.f32 %v654_v17  ;;  %v585_v62 = vsub.f32 %v1738_v57, %v1808_v36 }
 0x2a8   : > { %v1881_v16 = vpop.eup %1360  ;;  %v702_v3 = vpack.c.bf16 %v1359_v13, %v1357_v56  ;;  %1372 = vpow2.f32 %v656_v14  ;;  %v648_v5 = vmul.f32 1.442695, %v589_v52 }
 0x2a9   : > { %v665_v63 = vadd.f32 %v1871_v47, %v664_v12  ;;  %v1886_v20 = vpop.eup %1362  ;;  %1374 = vpow2.f32 %v650_v50  ;;  %v329_v50 = vpop.f32.mrf.mxu2 }
 0x2aa   : > { %v1890_v40 = vpop.eup %1364  ;;  %711 = vmatpush.bf16.msra.mxu1 %v702_v3  ;;  %v703_v42 = vpack.c.bf16 %v1886_v20, %v1881_v16  ;;  %1376 = vpow2.f32 %v652_v9 }
 0x2ab   : > { %v666_v6 = vadd.f32 %v1873_v23, %v665_v63  ;;  %v1897_v8 = vpop.eup %1366  ;;  %v583_v63 = vsub.f32 %v1730_v53, %v1808_v36  ;;  %v584_v53 = vsub.f32 %v1734_v55, %v1808_v36  ;;  %1378 = vpow2.f32 %v646_v15 }
 0x2ac   : > { %v704_v0 = vpack.c.bf16 %v1897_v8, %v1890_v40  ;;  %v1369_v32 = vpop.eup %1368  ;;  %1380 = vpow2.f32 %v648_v5  ;;  %v640_v36 = vmul.f32 1.442695, %v585_v62  ;;  %v330_v15 = vadd.f32 %v329_v50, %v293_v10 }
 0x2ad   : > { %v667_v21 = vadd.f32 %v1351_v24, %v666_v6  ;;  %v700_v61 = vpack.c.bf16 %v1369_v32, %v1351_v24  ;;  %v699_v24 = vpack.c.bf16 %v1873_v23, %v1871_v47  ;;  %v636_v6 = vmul.f32 1.442695, %v583_v63  ;;  %v1919_v38 = vpop.eup %1370 }
 0x2ae   : > { %712 = vmatpush.bf16.msra.mxu1 %v701_v45  ;;  %v1921_v26 = vpop.eup %1372  ;;  %1382 = vpow2.f32 %v634_v51  ;;  %v698_v23 = vpack.c.bf16 %v1868_v46, %v1864_v44  ;;  %v696_v63 = vpack.c.bf16 %v1852_v22, %v1848_v19  ;;  %v695_v5 = vpack.c.bf16 %v1840_v58, %v1836_v11 }
 0x2af   : > { %v668_v49 = vadd.f32 %v1369_v32, %v667_v21  ;;  %v644_v21 = vmul.f32 1.442695, %v587_v4  ;;  %v710_v55 = vpack.c.bf16 %v1921_v26, %v1919_v38  ;;  %1384 = vpow2.f32 %v636_v6 }
 0x2b0   : > { %1386 = vpow2.f32 %v642_v60 }
 0x2b1   : > { %v669_v12 = vadd.f32 %v1353_v59, %v668_v49  ;;  %724 = vmatpush.bf16.msra.mxu2 %v710_v55  ;;  %1388 = vpow2.f32 %v644_v21 }
 0x2b2   : > { %713 = vmatpush.bf16.msra.mxu1 %v700_v61 }
 0x2b3   : > { %v670_v3 = vadd.f32 %v1355_v54, %v669_v12 }
 0x2b5   : > { %v671_v59 = vadd.f32 %v1357_v56, %v670_v3  ;;  %v1375_v56 = vpop.eup %1374 }
 0x2b6   : > { %714 = vmatpush.bf16.msra.mxu1 %v699_v24  ;;  %v1377_v17 = vpop.eup %1376 }
 0x2b7   : > { %v672_v54 = vadd.f32 %v1359_v13, %v671_v59  ;;  %v638_v13 = vmul.f32 1.442695, %v584_v53  ;;  %v1379_v57 = vpop.eup %1378  ;;  %v709_v14 = vpack.c.bf16 %v1377_v17, %v1375_v56  ;;  %v1939_v59 = vpack.c.bf16 %v330_v15, %v330_v15 }
 0x2b8   : > { %v1381_v49 = vpop.eup %1380 }
 0x2b9   : > { %v673_v47 = vadd.f32 %v1881_v16, %v672_v54  ;;  %1390 = vpow2.f32 %v638_v13  ;;  %v1383_v44 = vpop.eup %1382  ;;  %725 = vmatpush.bf16.msra.mxu2 %v709_v14  ;;  %v708_v61 = vpack.c.bf16 %v1381_v49, %v1379_v57  ;;  %v802_v54 = vunpack.c.h.b16 %v1633_v18 }
 0x2ba   : > { %715 = vmatpush.bf16.msra.mxu1 %v698_v23  ;;  %v1385_v52 = vpop.eup %1384  ;;  %1392 = vpow2.f32 %v640_v36 }
 0x2bb   : > { %v674_v45 = vadd.f32 %v1886_v20, %v673_v47  ;;  %v1387_v9 = vpop.eup %1386  ;;  %v705_v60 = vpack.c.bf16 %v1385_v52, %v1383_v44  ;;  %v803_v11 = vpack.c.b16 %v802_v54, %v802_v54  ;;  %v353_v47 = vadd.f32 %v1720_v48, %v293_v10 }
 0x2bc   : > { %v1389_v1 = vpop.eup %1388  ;;  %v2282_v48 = vmov 0  }
 0x2bd   : > { %v675_v32 = vadd.f32 %v1890_v40, %v674_v45  ;;  %726 = vmatpush.bf16.msra.mxu2 %v708_v61  ;;  %v707_v4 = vpack.c.bf16 %v1389_v1, %v1387_v9  ;;  %v805_v23 = vsel %vm240_vm0, %v803_v11, 0  ;;  %v1953_v13 = vpack.c.bf16 %v353_v47, %v353_v47  ;;  %v2285_v45 = vld [vmem:[#allocation5_spill] sm:$0xff] }
 0x2be   : > { %716 = vmatpush.bf16.msra.mxu1 %v697_v7 }
 0x2bf   : > { %v676_v46 = vadd.f32 %v1897_v8, %v675_v32  ;;  %v1391_v43 = vpop.eup %1390  ;;  %v2287_v32 = vld [vmem:[#allocation9_spill] sm:$0xff] }
 0x2c0   : > { %v1393_v51 = vpop.eup %1392 }
 0x2c1   : > { %v677_v12 = vadd.f32 %v1383_v44, %v676_v46  ;;  %727 = vmatpush.bf16.msra.mxu2 %v707_v4  ;;  %v706_v6 = vpack.c.bf16 %v1393_v51, %v1391_v43 }
 0x2c2   : > { %717 = vmatpush.bf16.msra.mxu1 %v696_v63 }
 0x2c3   : > { %v678_v2 = vadd.f32 %v1385_v52, %v677_v12 }
 0x2c5   : > { %v679_v3 = vadd.f32 %v1391_v43, %v678_v2  ;;  %728 = vmatpush.bf16.msra.mxu2 %v706_v6 }
 0x2c6   : > { %718 = vmatpush.bf16.msra.mxu1 %v695_v5 }
 0x2c7   : > { %v680_v24 = vadd.f32 %v1393_v51, %v679_v3 }
 0x2c9   : > { %v681_v53 = vadd.f32 %v1387_v9, %v680_v24  ;;  %719 = vmatmul.bf16.vlgmr.msra.gmra.mxu1 %v1939_v59  ;;  %729 = vmatpush.bf16.msra.mxu2 %v705_v60 }
 0x2cb   : > { %v682_v19 = vadd.f32 %v1389_v1, %v681_v53 }
 0x2cd   : > { %v683_v22 = vadd.f32 %v1379_v57, %v682_v19  ;;  %730 = vmatpush.bf16.msra.mxu2 %v704_v0 }
 0x2cf   : > { %v684_v62 = vadd.f32 %v1381_v49, %v683_v22 }
 0x2d1   : > { %v685_v21 = vadd.f32 %v1375_v56, %v684_v62  ;;  %731 = vmatpush.bf16.msra.mxu2 %v703_v42 }
 0x2d3   : > { %v686_v58 = vadd.f32 %v1377_v17, %v685_v21  ;;  %v2284_v17 = vld [vmem:[#allocation7_spill] sm:$0xff] }
 0x2d4   : > { %732 = vmatmul.bf16.vlgmr.msra.gmra.mxu2 %v1953_v13 }
 0x2d5   : > { %v687_v55 = vadd.f32 %v1919_v38, %v686_v58  ;;  %814 = vmatpush.bf16.msrb.mxu2 %v805_v23 }
 0x2d7   : > { %v688_v18 = vadd.f32 %v1921_v26, %v687_v55 }
 0x2d9   : > { %v689_v16 = vrot.slane %v688_v18, 4 }
 0x2db   : > { %v690_v20 = vadd.f32 %v689_v16, %v688_v18 }
 0x2dd   : > { %v691_v40 = vrot.slane %v690_v20, 2 }
 0x2df   : > { %v692_v42 = vadd.f32 %v691_v40, %v690_v20 }
 0x2e1   : > { %v693_v8 = vrot.slane %v692_v42, 1 }
 0x2e3   : > { %v694_v0 = vadd.f32 %v693_v8, %v692_v42 }
 0x2e4   : > { %1259 = vmatmul.msk.bf16.vlgmr.msrb.gmra.mxu2 %vm384_vm2, %v1638_v25 }
 0x2e5   : > { %1394 = vrcp.f32 %v694_v0 }
 0x2eb   : > { %v1395_v26 = vpop.eup %1394 }
 0x2f4   : > { %1260 = vmatmul.msk.bf16.gmra.mxu2 %vm384_vm2, %v1649_v28 }
 0x300   : > { %1329 = vset.pattern.permute.xlu2 %v2282_v48 }
 0x304   : > { %1261 = vmatmul.msk.bf16.gmra.mxu2 %vm384_vm2, %v1655_v30 }
 0x314   : > { %1262 = vmatmul.msk.bf16.gmra.mxu2 %vm384_vm2, %v1666_v33 }
 0x324   : > { %1263 = vmatmul.msk.bf16.gmra.mxu2 %vm384_vm2, %v1674_v35 }
 0x334   : > { %1264 = vmatmul.msk.bf16.gmra.mxu2 %vm384_vm2, %v1682_v37  ;;  %v226_v37 = vld [vmem:[%s2267_s3 + $0x18] sm:$0xf] }
 0x335   : > { %741 = vperm.xlu2 %1329, %v226_v37  }
 0x337   : > { %v1969_v56 = vpop.trf.xlu2 }
 0x346   : > { %v720_v25 = vpop.f32.mrf.mxu1 }
 0x34e   : > { %v722_v28 = vpop.f32.mrf.mxu1 }
 0x357   : > { %v733_v30 = vpop.f32.mrf.mxu2 }
 0x358   : > { %v734_v38 = vadd.f32 %v733_v30, %v720_v25 }
 0x35a   : > { %v738_v33 = vmul.f32 %v1395_v26, %v734_v38 }
 0x35c   : > { %794 = vmatpush.msra.mxu3 %v738_v33 }
 0x35d   : > { %1258 = vmatmul.msk.f32.vlgmr.msra.gmra.mxu3 %vm384_vm2, %v1969_v56 }
 0x35e   : > { %1285 = vmatpush.bf16.msrb.mxu3 %v805_v23 }
 0x35f   : > { %v735_v35 = vpop.f32.mrf.mxu2 }
 0x365   : > { %1265 = vmatmul.msk.bf16.vlgmr.msrb.gmra.mxu3 %vm384_vm2, %v1690_v39  ;;  %v2283_v39 = vld [vmem:[#allocation6_spill] sm:$0xff] }
 0x367   : > { %v2014_v49 = vpop.f32.mrf.mxu2 }
 0x36f   : > { %v2018_v46 = vpop.f32.mrf.mxu2 }
 0x375   : > { %1266 = vmatmul.msk.bf16.gmra.mxu3 %vm384_vm2, %v1698_v41 }
 0x377   : > { %v2024_v9 = vpop.f32.mrf.mxu2 }
 0x37f   : > { %v2028_v12 = vpop.f32.mrf.mxu2 }
 0x385   : > { %1267 = vmatmul.msk.bf16.gmra.mxu3 %vm384_vm2, %v1647_v27 }
 0x387   : > { %v2032_v63 = vpop.f32.mrf.mxu2 }
 0x388   : > { %v896_v11 = vmax.f32 %v2014_v49, %v2032_v63 }
 0x38f   : > { %v1993_v41 = vpop.permute.xlu2 %741  ;;  %v2036_v15 = vpop.f32.mrf.mxu2 }
 0x390   : > { %v897_v62 = vmax.f32 %v2018_v46, %v2036_v15 }
 0x395   : > { %1268 = vmatmul.msk.bf16.gmra.mxu3 %vm384_vm2, %v1653_v29 }
 0x397   : > { %v2042_v3 = vpop.f32.mrf.mxu2 }
 0x398   : > { %v898_v58 = vmax.f32 %v2024_v9, %v2042_v3 }
 0x39f   : > { %v2046_v5 = vpop.f32.mrf.mxu2 }
 0x3a0   : > { %v899_v47 = vmax.f32 %v2028_v12, %v2046_v5 }
 0x3a5   : > { %1269 = vmatmul.msk.bf16.gmra.mxu3 %vm384_vm2, %v1659_v31  ;;  %v2286_v31 = vld [vmem:[#allocation8_spill] sm:$0xff] }
 0x3a7   : > { %v2050_v24 = vpop.f32.mrf.mxu2 }
 0x3a8   : > { %v900_v23 = vmax.f32 %v896_v11, %v2050_v24 }
 0x3af   : > { %v2054_v6 = vpop.f32.mrf.mxu2 }
 0x3b0   : > { %v901_v55 = vmax.f32 %v897_v62, %v2054_v6 }
 0x3b5   : > { %1270 = vmatmul.msk.bf16.gmra.mxu3 %vm384_vm2, %v1670_v34 }
 0x3b7   : > { %v2060_v60 = vpop.f32.mrf.mxu2 }
 0x3b8   : > { %v902_v18 = vmax.f32 %v898_v58, %v2060_v60 }
 0x3bf   : > { %v2066_v21 = vpop.f32.mrf.mxu2 }
 0x3c0   : > { %v903_v48 = vmax.f32 %v899_v47, %v2066_v21 }
 0x3c5   : > { %1271 = vmatmul.msk.bf16.gmra.mxu3 %vm384_vm2, %v2283_v39 }
 0x3d5   : > { %1272 = vmatmul.msk.bf16.gmra.mxu3 %vm384_vm2, %v2284_v17 }
 0x3e0   : > { %v796_v27 = vpop.f32.mrf.mxu3 }
 0x3e1   : > { %v797_v29 = vadd.f32 %v796_v27, %v1993_v41 }
 0x3e3   : > { %v799_v36 = vadd.f32 %v797_v29, %v2285_v45 }
 0x3e5   : > { %800 = vst [vmem:[%s1999_s10] sm:$0xf] %v799_v36  ;;  %1273 = vmatmul.msk.bf16.gmra.mxu3 %vm384_vm2, %v2286_v31 }
 0x3e8   : > { %v2004_v34 = vpop.f32.mrf.mxu3 }
 0x3e9   : > { %v904_v25 = vmax.f32 %v900_v23, %v2004_v34 }
 0x3f0   : > { %v2006_v57 = vpop.f32.mrf.mxu3 }
 0x3f1   : > { %v905_v16 = vmax.f32 %v901_v55, %v2006_v57 }
 0x3f5   : > { %1274 = vmatmul.msk.bf16.gmra.mxu3 %vm384_vm2, %v2287_v32 }
 0x3f8   : > { %v2010_v14 = vpop.f32.mrf.mxu3 }
 0x3f9   : > { %v906_v40 = vmax.f32 %v902_v18, %v2010_v14 }
 0x400   : > { %v2012_v7 = vpop.f32.mrf.mxu3 }
 0x401   : > { %v907_v42 = vmax.f32 %v903_v48, %v2012_v7 }
 0x408   : > { %v2016_v44 = vpop.f32.mrf.mxu3 }
 0x409   : > { %v908_v8 = vmax.f32 %v904_v25, %v2016_v44 }
 0x410   : > { %v2020_v50 = vpop.f32.mrf.mxu3 }
 0x411   : > { %v909_v28 = vmax.f32 %v905_v16, %v2020_v50 }
 0x418   : > { %v2022_v52 = vpop.f32.mrf.mxu3 }
 0x419   : > { %v910_v0 = vmax.f32 %v906_v40, %v2022_v52 }
 0x420   : > { %v2026_v10 = vpop.f32.mrf.mxu3 }
 0x421   : > { %v911_v30 = vmax.f32 %v907_v42, %v2026_v10 }
 0x428   : > { %v2030_v61 = vpop.f32.mrf.mxu3 }
 0x429   : > { %v912_v26 = vmax.f32 %v908_v8, %v2030_v61 }
 0x430   : > { %v2034_v1 = vpop.f32.mrf.mxu3 }
 0x431   : > { %v913_v38 = vmax.f32 %v909_v28, %v2034_v1 }
 0x438   : > { %v2038_v2 = vpop.f32.mrf.mxu3 }
 0x439   : > { %v914_v33 = vmax.f32 %v910_v0, %v2038_v2 }
 0x440   : > { %v2040_v43 = vpop.f32.mrf.mxu3 }
 0x441   : > { %v915_v35 = vmax.f32 %v911_v30, %v2040_v43 }
 0x448   : > { %v2044_v4 = vpop.f32.mrf.mxu3 }
 0x449   : > { %v916_v39 = vmax.f32 %v912_v26, %v2044_v4 }
 0x450   : > { %v2048_v51 = vpop.f32.mrf.mxu3 }
 0x451   : > { %v917_v37 = vmax.f32 %v913_v38, %v2048_v51 }
 0x458   : > { %v2052_v53 = vpop.f32.mrf.mxu3 }
 0x459   : > { %v918_v17 = vmax.f32 %v914_v33, %v2052_v53 }
 0x460   : > { %v2056_v19 = vpop.f32.mrf.mxu3 }
 0x461   : > { %v919_v27 = vmax.f32 %v915_v35, %v2056_v19 }
 0x468   : > { %v2058_v22 = vpop.f32.mrf.mxu3 }
 0x469   : > { %v920_v36 = vmax.f32 %v916_v39, %v2058_v22 }
 0x470   : > { %v2062_v54 = vpop.f32.mrf.mxu3 }
 0x471   : > { %v921_v29 = vmax.f32 %v917_v37, %v2062_v54 }
 0x473   : > { %v924_v62 = vmax.f32 %v920_v36, %v921_v29 }
 0x478   : > { %v2079_v20 = vpop.f32.mrf.mxu3 }
 0x479   : > { %v922_v31 = vmax.f32 %v918_v17, %v2079_v20 }
 0x480   : > { %v2097_v45 = vpop.f32.mrf.mxu3 }
 0x481   : > { %v923_v32 = vmax.f32 %v919_v27, %v2097_v45 }
 0x483   : > { %v925_v11 = vmax.f32 %v922_v31, %v923_v32 }
 0x485   : > { %v926_v58 = vmax.f32 %v924_v62, %v925_v11 }
 0x487   : > { %v927_v47 = vrot.slane %v926_v58, 4 }
 0x489   : > { %v928_v55 = vmax.f32 %v926_v58, %v927_v47 }
 0x48b   : > { %v929_v23 = vrot.slane %v928_v55, 2 }
 0x48d   : > { %v930_v18 = vmax.f32 %v928_v55, %v929_v23 }
 0x48f   : > { %v931_v48 = vrot.slane %v930_v18, 1 }
 0x491   : > { %v2102_v16 = vmax.f32 %v930_v18, %v931_v48 }
 0x493   : > { %v933_v25 = vsub.f32 %v2014_v49, %v2102_v16  ;;  %v934_v40 = vsub.f32 %v2018_v46, %v2102_v16  ;;  %v935_v42 = vsub.f32 %v2024_v9, %v2102_v16  ;;  %v936_v28 = vsub.f32 %v2028_v12, %v2102_v16 }
 0x494   : > { %v937_v30 = vsub.f32 %v2032_v63, %v2102_v16  ;;  %v938_v26 = vsub.f32 %v2036_v15, %v2102_v16  ;;  %v939_v46 = vsub.f32 %v2042_v3, %v2102_v16  ;;  %v940_v9 = vsub.f32 %v2046_v5, %v2102_v16 }
 0x495   : > { %v965_v8 = vmul.f32 1.442695, %v933_v25  ;;  %v967_v0 = vmul.f32 1.442695, %v934_v40  ;;  %v969_v38 = vmul.f32 1.442695, %v935_v42  ;;  %v941_v33 = vsub.f32 %v2050_v24, %v2102_v16 }
 0x496   : > { %v971_v49 = vmul.f32 1.442695, %v936_v28  ;;  %v973_v12 = vmul.f32 1.442695, %v937_v30  ;;  %v942_v63 = vsub.f32 %v2054_v6, %v2102_v16  ;;  %v975_v35 = vmul.f32 1.442695, %v938_v26 }
 0x497   : > { %1396 = vpow2.f32 %v965_v8  ;;  %v947_v15 = vsub.f32 %v2010_v14, %v2102_v16  ;;  %v977_v39 = vmul.f32 1.442695, %v939_v46  ;;  %v948_v5 = vsub.f32 %v2012_v7, %v2102_v16 }
 0x498   : > { %1398 = vpow2.f32 %v967_v0  ;;  %v979_v17 = vmul.f32 1.442695, %v940_v9  ;;  %v945_v24 = vsub.f32 %v2004_v34, %v2102_v16  ;;  %v981_v27 = vmul.f32 1.442695, %v941_v33 }
 0x499   : > { %1400 = vpow2.f32 %v969_v38  ;;  %v946_v14 = vsub.f32 %v2006_v57, %v2102_v16  ;;  %v983_v36 = vmul.f32 1.442695, %v942_v63  ;;  %v993_v31 = vmul.f32 1.442695, %v947_v15 }
 0x49a   : > { %1402 = vpow2.f32 %v971_v49  ;;  %v943_v34 = vsub.f32 %v2060_v60, %v2102_v16  ;;  %v995_v62 = vmul.f32 1.442695, %v948_v5  ;;  %v989_v11 = vmul.f32 1.442695, %v945_v24 }
 0x49b   : > { %1404 = vpow2.f32 %v973_v12  ;;  %v944_v57 = vsub.f32 %v2066_v21, %v2102_v16  ;;  %v991_v55 = vmul.f32 1.442695, %v946_v14  ;;  %v959_v21 = vsub.f32 %v2052_v53, %v2102_v16 }
 0x49c   : > { %1406 = vpow2.f32 %v975_v35  ;;  %v985_v48 = vmul.f32 1.442695, %v943_v34  ;;  %v960_v30 = vsub.f32 %v2056_v19, %v2102_v16  ;;  %v949_v26 = vsub.f32 %v2016_v44, %v2102_v16 }
 0x49d   : > { %v2124_v37 = vpop.eup %1396  ;;  %1408 = vpow2.f32 %v977_v39  ;;  %v987_v42 = vmul.f32 1.442695, %v944_v57  ;;  %v950_v9 = vsub.f32 %v2020_v50, %v2102_v16  ;;  %v963_v12 = vsub.f32 %v2079_v20, %v2102_v16 }
 0x49e   : > { %v2128_v3 = vpop.eup %1398  ;;  %1410 = vpow2.f32 %v979_v17  ;;  %v1017_v33 = vmul.f32 1.442695, %v959_v21  ;;  %v964_v15 = vsub.f32 %v2097_v45, %v2102_v16  ;;  %v1019_v44 = vmul.f32 1.442695, %v960_v30 }
 0x49f   : > { %v1029_v6 = vadd.f32 %v2128_v3, %v2124_v37  ;;  %v2136_v29 = vpop.eup %1400  ;;  %1412 = vpow2.f32 %v981_v27  ;;  %v961_v39 = vsub.f32 %v2058_v22, %v2102_v16  ;;  %v997_v5 = vmul.f32 1.442695, %v949_v26 }
 0x4a0   : > { %v2141_v32 = vpop.eup %1402  ;;  %1414 = vpow2.f32 %v983_v36  ;;  %v962_v20 = vsub.f32 %v2062_v54, %v2102_v16  ;;  %v999_v24 = vmul.f32 1.442695, %v950_v9  ;;  %v1025_v27 = vmul.f32 1.442695, %v963_v12 }
 0x4a1   : > { %v1030_v7 = vadd.f32 %v2136_v29, %v1029_v6  ;;  %v2146_v47 = vpop.eup %1404  ;;  %1416 = vpow2.f32 %v993_v31  ;;  %v951_v45 = vsub.f32 %v2022_v52, %v2102_v16  ;;  %v1027_v31 = vmul.f32 1.442695, %v964_v15 }
 0x4a2   : > { %v2151_v18 = vpop.eup %1406  ;;  %1418 = vpow2.f32 %v995_v62  ;;  %v1021_v22 = vmul.f32 1.442695, %v961_v39  ;;  %v952_v34 = vsub.f32 %v2026_v10, %v2102_v16  ;;  %v1023_v54 = vmul.f32 1.442695, %v962_v20 }
 0x4a3   : > { %v1031_v58 = vadd.f32 %v2141_v32, %v1030_v7  ;;  %v2153_v60 = vpop.eup %1408  ;;  %1420 = vpow2.f32 %v989_v11  ;;  %v953_v62 = vsub.f32 %v2030_v61, %v2102_v16  ;;  %v954_v52 = vsub.f32 %v2034_v1, %v2102_v16 }
 0x4a4   : > { %v2156_v40 = vpop.eup %1410  ;;  %1422 = vpow2.f32 %v991_v55  ;;  %v1001_v57 = vmul.f32 1.442695, %v951_v45  ;;  %v958_v61 = vsub.f32 %v2048_v51, %v2102_v16  ;;  %v955_v26 = vsub.f32 %v2038_v2, %v2102_v16 }
 0x4a5   : > { %v1032_v23 = vadd.f32 %v2146_v47, %v1031_v58  ;;  %v2158_v28 = vpop.eup %1412  ;;  %1424 = vpow2.f32 %v985_v48  ;;  %v1005_v1 = vmul.f32 1.442695, %v953_v62  ;;  %v1069_v2 = vpack.c.bf16 %v2156_v40, %v2153_v60 }
 0x4a6   : > { %v2163_v0 = vpop.eup %1414  ;;  %1426 = vpow2.f32 %v987_v42  ;;  %v1068_v39 = vpack.c.bf16 %v2151_v18, %v2146_v47 }
 0x4a7   : > { %v1033_v25 = vadd.f32 %v2151_v18, %v1032_v23  ;;  %v1417_v38 = vpop.eup %1416  ;;  %1428 = vpow2.f32 %v1017_v33  ;;  %v957_v23 = vsub.f32 %v2044_v4, %v2102_v16  ;;  %v1070_v4 = vpack.c.bf16 %v2163_v0, %v2158_v28 }
 0x4a8   : > { %v1419_v46 = vpop.eup %1418  ;;  %1430 = vpow2.f32 %v1019_v44  ;;  %v1015_v33 = vmul.f32 1.442695, %v958_v61  ;;  %v1066_v18 = vpack.c.bf16 %v2128_v3, %v2124_v37 }
 0x4a9   : > { %v1034_v8 = vadd.f32 %v2153_v60, %v1033_v25  ;;  %v1421_v53 = vpop.eup %1420  ;;  %v1073_v19 = vpack.c.bf16 %v1419_v46, %v1417_v38  ;;  %1432 = vpow2.f32 %v997_v5  ;;  %v1003_v25 = vmul.f32 1.442695, %v952_v34 }
 0x4aa   : > { %v1423_v35 = vpop.eup %1422  ;;  %1434 = vpow2.f32 %v999_v24  ;;  %v1013_v9 = vmul.f32 1.442695, %v957_v23  ;;  %v1067_v24 = vpack.c.bf16 %v2141_v32, %v2136_v29 }
 0x4ab   : > { %v1035_v49 = vadd.f32 %v2156_v40, %v1034_v8  ;;  %1082 = vmatpush.bf16.msrb.mxu1 %v1073_v19  ;;  %v1425_v17 = vpop.eup %1424  ;;  %v1072_v14 = vpack.c.bf16 %v1423_v35, %v1421_v53  ;;  %1436 = vpow2.f32 %v1025_v27 }
 0x4ac   : > { %v1427_v36 = vpop.eup %1426  ;;  %1438 = vpow2.f32 %v1027_v31 }
 0x4ad   : > { %v1036_v63 = vadd.f32 %v2158_v28, %v1035_v49  ;;  %v1071_v58 = vpack.c.bf16 %v1427_v36, %v1425_v17  ;;  %v2190_v55 = vpop.eup %1428  ;;  %1440 = vpow2.f32 %v1021_v22  ;;  %v1007_v49 = vmul.f32 1.442695, %v954_v52 }
 0x4ae   : > { %v2194_v48 = vpop.eup %1430  ;;  %1442 = vpow2.f32 %v1023_v54 }
 0x4af   : > { %v1037_v50 = vadd.f32 %v2163_v0, %v1036_v63  ;;  %1083 = vmatpush.bf16.msrb.mxu1 %v1072_v14  ;;  %v2198_v42 = vpop.eup %1432  ;;  %v1079_v8 = vpack.c.bf16 %v2194_v48, %v2190_v55  ;;  %1444 = vpow2.f32 %v1001_v57 }
 0x4b0   : > { %v2204_v30 = vpop.eup %1434  ;;  %1446 = vpow2.f32 %v1003_v25 }
 0x4b1   : > { %v1038_v6 = vadd.f32 %v1425_v17, %v1037_v50  ;;  %v1437_v51 = vpop.eup %1436  ;;  %1448 = vpow2.f32 %v1005_v1  ;;  %v1074_v3 = vpack.c.bf16 %v2204_v30, %v2198_v42 }
 0x4b2   : > { %v1439_v12 = vpop.eup %1438  ;;  %1450 = vpow2.f32 %v1007_v49 }
 0x4b3   : > { %v1039_v7 = vadd.f32 %v1427_v36, %v1038_v6  ;;  %1084 = vmatpush.bf16.msrb.mxu1 %v1071_v58  ;;  %v1441_v63 = vpop.eup %1440  ;;  %v1081_v0 = vpack.c.bf16 %v1439_v12, %v1437_v51  ;;  %1452 = vpow2.f32 %v1013_v9 }
 0x4b4   : > { %v1443_v19 = vpop.eup %1442  ;;  %1454 = vpow2.f32 %v1015_v33 }
 0x4b5   : > { %v1040_v11 = vadd.f32 %v1421_v53, %v1039_v7  ;;  %1095 = vmatpush.bf16.msra.mxu2 %v1081_v0  ;;  %v1445_v15 = vpop.eup %1444  ;;  %v1080_v44 = vpack.c.bf16 %v1443_v19, %v1441_v63 }
 0x4b6   : > { %v1447_v5 = vpop.eup %1446 }
 0x4b7   : > { %v1041_v10 = vadd.f32 %v1423_v35, %v1040_v11  ;;  %1085 = vmatpush.bf16.msrb.mxu1 %v1070_v4  ;;  %v1009_v35 = vmul.f32 1.442695, %v955_v26  ;;  %v1449_v50 = vpop.eup %1448  ;;  %v1075_v11 = vpack.c.bf16 %v1447_v5, %v1445_v15 }
 0x4b8   : > { %v1451_v40 = vpop.eup %1450 }
 0x4b9   : > { %v1042_v21 = vadd.f32 %v1417_v38, %v1041_v10  ;;  %v956_v38 = vsub.f32 %v2040_v43, %v2102_v16  ;;  %1456 = vpow2.f32 %v1009_v35  ;;  %1096 = vmatpush.bf16.msra.mxu2 %v1080_v44  ;;  %v1453_v17 = vpop.eup %1452  ;;  %v1076_v32 = vpack.c.bf16 %v1451_v40, %v1449_v50 }
 0x4ba   : > { %v1455_v27 = vpop.eup %1454 }
 0x4bb   : > { %v1043_v53 = vadd.f32 %v1419_v46, %v1042_v21  ;;  %1086 = vmatpush.bf16.msrb.mxu1 %v1069_v2  ;;  %v1011_v43 = vmul.f32 1.442695, %v956_v38  ;;  %v1078_v47 = vpack.c.bf16 %v1455_v27, %v1453_v17 }
 0x4bd   : > { %v1044_v28 = vadd.f32 %v2198_v42, %v1043_v53  ;;  %1458 = vpow2.f32 %v1011_v43  ;;  %1097 = vmatpush.bf16.msra.mxu2 %v1079_v8 }
 0x4bf   : > { %v1045_v46 = vadd.f32 %v2204_v30, %v1044_v28  ;;  %1087 = vmatpush.bf16.msrb.mxu1 %v1068_v39  ;;  %v1457_v14 = vpop.eup %1456  ;;  %v1131_v30 = vld.sshfl [vmem:[#allocation1 + $0x8] sm:$0xff pattern:$0x75316420] }
 0x4c1   : > { %v1046_v16 = vadd.f32 %v1445_v15, %v1045_v46  ;;  %1098 = vmatpush.bf16.msra.mxu2 %v1078_v47 }
 0x4c3   : > { %v1047_v60 = vadd.f32 %v1447_v5, %v1046_v16  ;;  %1088 = vmatpush.bf16.msrb.mxu1 %v1067_v24  ;;  %v1459_v45 = vpop.eup %1458 }
 0x4c4   : > { %v1077_v7 = vpack.c.bf16 %v1459_v45, %v1457_v14 }
 0x4c5   : > { %v1048_v20 = vadd.f32 %v1449_v50, %v1047_v60 }
 0x4c6   : > { %1099 = vmatpush.bf16.msra.mxu2 %v1077_v7 }
 0x4c7   : > { %v1049_v6 = vadd.f32 %v1451_v40, %v1048_v20  ;;  %1089 = vmatpush.bf16.msrb.mxu1 %v1066_v18 }
 0x4c9   : > { %v1050_v36 = vadd.f32 %v1457_v14, %v1049_v6 }
 0x4ca   : > { %1090 = vmatmul.bf16.vlgmr.msrb.gmra.mxu1 %v1939_v59  ;;  %1100 = vmatpush.bf16.msra.mxu2 %v1076_v32 }
 0x4cb   : > { %v1051_v31 = vadd.f32 %v1459_v45, %v1050_v36 }
 0x4cd   : > { %v1052_v22 = vadd.f32 %v1453_v17, %v1051_v31 }
 0x4ce   : > { %1101 = vmatpush.bf16.msra.mxu2 %v1075_v11 }
 0x4cf   : > { %v1053_v34 = vadd.f32 %v1455_v27, %v1052_v22 }
 0x4d1   : > { %v1054_v29 = vadd.f32 %v2190_v55, %v1053_v34 }
 0x4d2   : > { %1102 = vmatpush.bf16.msra.mxu2 %v1074_v3 }
 0x4d3   : > { %v1055_v54 = vadd.f32 %v2194_v48, %v1054_v29 }
 0x4d5   : > { %v1056_v62 = vadd.f32 %v1441_v63, %v1055_v54  ;;  %1103 = vmatmul.bf16.vlgmr.msra.gmra.mxu2 %v1953_v13 }
 0x4d7   : > { %v1057_v58 = vadd.f32 %v1443_v19, %v1056_v62 }
 0x4d9   : > { %v1058_v37 = vadd.f32 %v1437_v51, %v1057_v58 }
 0x4db   : > { %v1059_v52 = vadd.f32 %v1439_v12, %v1058_v37 }
 0x4dd   : > { %v1060_v59 = vrot.slane %v1059_v52, 4 }
 0x4df   : > { %v1061_v57 = vadd.f32 %v1060_v59, %v1059_v52 }
 0x4e1   : > { %v1062_v23 = vrot.slane %v1061_v57, 2 }
 0x4e3   : > { %v1063_v10 = vadd.f32 %v1062_v23, %v1061_v57 }
 0x4e5   : > { %v1064_v61 = vrot.slane %v1063_v10, 1 }
 0x4e7   : > { %v1065_v25 = vadd.f32 %v1064_v61, %v1063_v10 }
 0x4e9   : > { %1460 = vrcp.f32 %v1065_v25 }
 0x4ef   : > { %v1461_v8 = vpop.eup %1460 }
 0x547   : > { %v1091_v55 = vpop.f32.mrf.mxu1 }
 0x54f   : > { %v1093_v48 = vpop.f32.mrf.mxu1 }
 0x558   : > { %v1104_v1 = vpop.f32.mrf.mxu2 }
 0x559   : > { %v1105_v21 = vadd.f32 %v1104_v1, %v1091_v55 }
 0x55b   : > { %v1109_v42 = vmul.f32 %v1461_v8, %v1105_v21 }
 0x55d   : > { %1125 = vmatpush.msra.mxu1 %v1109_v42 }
 0x55e   : > { %1275 = vmatmul.msk.f32.vlgmr.msra.gmra.mxu1 %vm384_vm2, %v1969_v56 }
 0x560   : > { %v1106_v13 = vpop.f32.mrf.mxu2 }
 0x5db   : > { %v1127_v4 = vpop.f32.mrf.mxu1 }
 0x5dc   : > { %v1128_v26 = vadd.f32 %v1127_v4, %v1993_v41 }
 0x5de   : > { %v1133_v49 = vadd.f32 %v1131_v30, %v1128_v26 }
 0x5e0   : > { %1134 = vst [vmem:[%s1999_s10 + $0x4] sm:$0xf] %v1133_v49 }
 0x5e1   : > { %1489 = shalt.err (!%p1486_p3)
}
 0x5e2   : > { %1286 = dma.vmem_to_hbm [thread:$0]  (%p1590_p5), %s1150_s20, 128, %s1152_s22, %s1136_s23  }
 0x5e3 PF: > { %p1292_p4 = scmp.ge.s32.totalorder %s1524_s18, 2  ;;  %s1163_s7 = sand.u32 1, %s1512_s15  }
 0x5e4   : > { %s1164_s8 = scalar_lea.sflag [#allocation3], %s1163_s7 }
 0x5e5   : > { %p1289_p7 = pnand %p1292_p4, %p1594_p6 }
 0x5e7   : > { %p1290_p8 = pneg %p1289_p7 }
 0x5e9   : > { %1507 = dma.done.wait (%p1290_p8), %s1164_s8, 128  }
 0x5ea   : > { %1509 = vsyncadd (%p1290_p8), %s1164_s8, 4294967168  ;;  %p14_p9 = scmp.ge.s32.totalorder %s1577_s21, 4   ;;  %s2288_s15 = smov %s1516_s16 }
 0x5eb   : > { %s2289_s16 = smov %s1520_s17  ;;  %s2290_s17 = smov %s1588_s24 }
 0x5ec   : > { %s2291_s18 = smov %s1577_s21  ;;  %16 = sbr.rel (!%p14_p9) target bundleno = 3 (0x3), region = 74 }
 0x5f1   :  { %1170 = vsyncpa [#allocation3], 1 }
 0x5f2   :  { %1172 = vsyncpa [#allocation3 + $0x1], 1 }

</bundles_post_ra>
